<compile_context>
chip_gen: v6e
topology: v6e:2x2x1
jax: 0.10.0
libtpu: 0.0.40
codegen_flags: <defaults>
</compile_context>

<pallas_src>
import math
import functools

import jax
import jax.numpy as jnp
from jax.experimental import pallas as pl
from jax.experimental.pallas import tpu as pltpu


# ----------------------------- parameter / buffer setup (glue) -----------------------------
def make_positional_encoding_table(max_len: int, d_model: int, dtype=jnp.float32):
    """Deterministic pe buffer, identical to the PyTorch __init__ construction."""
    position = jnp.arange(max_len, dtype=jnp.float32)[:, None]                       # (L, 1)
    div_term = jnp.exp(
        jnp.arange(0, d_model, 2, dtype=jnp.float32) * (-math.log(10000.0) / d_model)
    )                                                                                # (ceil(D/2),)
    pe = jnp.zeros((max_len, d_model), jnp.float32)
    pe = pe.at[:, 0::2].set(jnp.sin(position * div_term))
    pe = pe.at[:, 1::2].set(jnp.cos(position * div_term[: d_model // 2]))            # odd-D safe
    # unsqueeze(0).transpose(0, 1) -> (max_len, 1, d_model)
    return pe[:, None, :].astype(dtype)


# ----------------------------------- Pallas kernels (hot path) ------------------------------
def _pos_enc_eval_kernel(x_ref, pe_ref, o_ref, *, batch):
    # x_ref: (ts, B*D) lane-dense tile;  pe_ref: (ts, D) tile shared across batch.
    pe = pe_ref[...]
    if batch > 1:
        # Tile pe along the lane axis so pe[s, d] lands at column b*D + d for every b.
        pe = jnp.concatenate([pe] * batch, axis=-1)          # (ts, B*D)
    # Add in the native I/O dtype (no f32 round-trip for an elementwise add).
    o_ref[...] = x_ref[...] + pe


def _pos_enc_train_kernel(seed_ref, x_ref, pe_ref, o_ref, *, batch, dropout_p):
    pe = pe_ref[...]
    if batch > 1:
        pe = jnp.concatenate([pe] * batch, axis=-1)          # (ts, B*D)
    y = x_ref[...] + pe

    # Inverted dropout with on-chip PRNG.  Seed with two independent words
    # (user seed, grid step) so per-tile streams are not sequentially-adjacent seeds.
    pltpu.prng_seed(seed_ref[0], pl.program_id(0))
    bits = pltpu.bitcast(pltpu.prng_random_bits(y.shape), jnp.uint32)

    # drop  iff  bits < round(p * 2^32)   =>   P(keep) = 1 - p.
    # Pure unsigned-integer compare: no shift, no int->float convert, no multiply.
    threshold = jnp.uint32(int(round(dropout_p * float(1 << 32))) & 0xFFFFFFFF)
    keep = bits >= threshold

    scale = jnp.asarray(1.0 / (1.0 - dropout_p), dtype=y.dtype)
    o_ref[...] = jnp.where(keep, y * scale, jnp.zeros_like(y))


# ----------------------------------------- wrapper -----------------------------------------
def _choose_seq_tile(S: int, row_bytes: int, target_bytes: int = 2 << 20) -> int:
    """Largest seq tile (multiple of 8, divides S) with <= ~2 MiB per x block."""
    if S % 8 != 0:
        return S  # second-minor block dim must be a multiple of 8 or equal the full dim
    divs = [d for d in range(8, S + 1, 8) if S % d == 0]
    fitting = [d for d in divs if d * row_bytes <= target_bytes]
    return max(fitting) if fitting else min(divs)


def positional_encoding_forward(x, pe, *, dropout_p=0.1, train=False, seed=0,
                                seq_tile=None, target_block_bytes=2 << 20):
    """x: (S, B, D); pe: (max_len, 1, D).  Returns dropout(x + pe[:S])."""
    S, B, D = x.shape
    assert pe.shape[0] >= S and pe.shape[-1] == D

    pe_s = pe[:S].reshape(S, D).astype(x.dtype)      # (S, D): never broadcast in HBM
    x2 = x.reshape(S, B * D)                         # free view: (S,B,D) is contiguous this way

    row_bytes = B * D * x.dtype.itemsize
    ts = seq_tile if seq_tile is not None else _choose_seq_tile(S, row_bytes, target_block_bytes)
    assert S % ts == 0 and (ts % 8 == 0 or ts == S), "bad seq tile"
    grid = (S // ts,)

    cparams = pltpu.CompilerParams(
        dimension_semantics=("parallel",),           # no cross-step dep -> shard across TCs (v7x)
        vmem_limit_bytes=32 * 1024 * 1024,           # explicit: fits v7x 64 MiB, lifts v5e 16 MiB default
    )

    use_dropout = bool(train) and float(dropout_p) > 0.0
    if use_dropout:
        assert 0.0 < float(dropout_p) < 1.0, "dropout_p must be in [0, 1)"
        kernel = functools.partial(_pos_enc_train_kernel, batch=B, dropout_p=float(dropout_p))
        out2 = pl.pallas_call(
            kernel,
            out_shape=jax.ShapeDtypeStruct((S, B * D), x.dtype),
            grid_spec=pltpu.PrefetchScalarGridSpec(
                num_scalar_prefetch=1,               # seed scalar lives in SMEM
                grid=grid,
                in_specs=[
                    pl.BlockSpec((ts, B * D), lambda i, seed_ref: (i, 0)),
                    pl.BlockSpec((ts, D), lambda i, seed_ref: (i, 0)),
                ],
                out_specs=pl.BlockSpec((ts, B * D), lambda i, seed_ref: (i, 0)),
            ),
            compiler_params=cparams,
        )(jnp.asarray([seed], dtype=jnp.int32), x2, pe_s)
    else:
        kernel = functools.partial(_pos_enc_eval_kernel, batch=B)
        out2 = pl.pallas_call(
            kernel,
            out_shape=jax.ShapeDtypeStruct((S, B * D), x.dtype),
            grid_spec=pltpu.PrefetchScalarGridSpec(
                num_scalar_prefetch=0,
                grid=grid,
                in_specs=[
                    pl.BlockSpec((ts, B * D), lambda i: (i, 0)),
                    pl.BlockSpec((ts, D), lambda i: (i, 0)),
                ],
                out_specs=pl.BlockSpec((ts, B * D), lambda i: (i, 0)),
            ),
            compiler_params=cparams,
        )(x2, pe_s)

    return out2.reshape(S, B, D)


# ------------------------------------------- main ------------------------------------------
if __name__ == "__main__":
    S, B, D = 8, 2, 32      # seq, batch, d_model
    MAX_LEN = 64

    key = jax.random.PRNGKey(0)
    x = jax.random.normal(key, (S, B, D), dtype=jnp.float32)
    pe = make_positional_encoding_table(MAX_LEN, D)

    # Eval-mode (dropout = identity): deterministic, compare against reference.
    out_eval = positional_encoding_forward(x, pe, dropout_p=0.1, train=False)
    out_eval = jax.block_until_ready(out_eval)
    ref = x + pe[:S]
    assert out_eval.shape == (S, B, D)
    assert jnp.allclose(out_eval, ref, atol=1e-6, rtol=1e-6), "mismatch vs reference"

    # Train-mode path uses the on-chip hardware PRNG (pltpu.prng_*), which has no CPU /
    # interpreter lowering — only exercise it when a real TPU backend is present.
    if jax.default_backend() == "tpu":
        p = 0.1
        out_train = positional_encoding_forward(x, pe, dropout_p=p, train=True, seed=123)
        out_train = jax.block_until_ready(out_train)
        assert out_train.shape == (S, B, D)
        # Sanity: dropped elements are exactly 0; kept elements are ref / (1-p).
        kept = out_train != 0
        assert jnp.allclose(jnp.where(kept, out_train, 0.0),
                            jnp.where(kept, ref / (1.0 - p), 0.0),
                            atol=1e-5, rtol=1e-5), "train-mode survivors mis-scaled"

    print("KERNEL_OK")
</pallas_src>

<mosaic_0001>
module attributes {stable_mosaic.version = 11 : i64} {
  func.func @_pos_enc_eval_kernel(%arg0: i32, %arg1: memref<8x64xf32, #tpu.memory_space<vmem>>, %arg2: memref<8x32xf32, #tpu.memory_space<vmem>>, %arg3: memref<8x64xf32, #tpu.memory_space<vmem>>) attributes {dimension_semantics = [#tpu.dimension_semantics<parallel>], iteration_bounds = array<i64: 1>, scalar_prefetch = 0 : i64, scratch_operands = 0 : i64, tpu.core_type = #tpu.core_type<tc>, window_params = [{transform_indices = @transform_0, window_bounds = array<i64: 8, 64>}, {transform_indices = @transform_1, window_bounds = array<i64: 8, 32>}, {transform_indices = @transform_2, window_bounds = array<i64: 8, 64>}]} {
    %c0 = arith.constant 0 : index
    %c0_0 = arith.constant 0 : index
    %0 = vector.load %arg2[%c0, %c0_0] : memref<8x32xf32, #tpu.memory_space<vmem>>, vector<8x32xf32>
    %1 = tpu.concatenate %0, %0 in 1 : vector<8x32xf32>, vector<8x32xf32> -> vector<8x64xf32>
    %c0_1 = arith.constant 0 : index
    %c0_2 = arith.constant 0 : index
    %2 = vector.load %arg1[%c0_1, %c0_2] : memref<8x64xf32, #tpu.memory_space<vmem>>, vector<8x64xf32>
    %3 = arith.addf %2, %1 : vector<8x64xf32>
    %c0_3 = arith.constant 0 : index
    %c0_4 = arith.constant 0 : index
    %4 = vector.load %arg3[%c0_3, %c0_4] : memref<8x64xf32, #tpu.memory_space<vmem>>, vector<8x64xf32>
    tpu.vector_store %arg3[%c0_3, %c0_4], %3 {strides = array<i32>} : memref<8x64xf32, #tpu.memory_space<vmem>>, vector<8x64xf32>,
    return
  }
  func.func @transform_0(%arg0: i32) -> (i32, i32) {
    %c0_i32 = arith.constant 0 : i32
    %c0_i32_0 = arith.constant 0 : i32
    return %arg0, %c0_i32 : i32, i32
  }
  func.func @transform_1(%arg0: i32) -> (i32, i32) {
    %c0_i32 = arith.constant 0 : i32
    %c0_i32_0 = arith.constant 0 : i32
    return %arg0, %c0_i32 : i32, i32
  }
  func.func @transform_2(%arg0: i32) -> (i32, i32) {
    %c0_i32 = arith.constant 0 : i32
    %c0_i32_0 = arith.constant 0 : i32
    return %arg0, %c0_i32 : i32, i32
  }
}

</mosaic_0001>

<bundles_post_ra>
// kernel: tpu_custom_call.1
= control target key start
LH: loop header
LB: loop body
LE: loop exit
PB: predicated region body
PF: predicated region fallthrough
CT: control target
= control target key end

     0   :  { %7 = vsyncpa [#allocation3], 0  ;;  %s161_s0 = inlined_call_operand.hbm [shape: f32[8,64], index: 0, kind: input, shape index: {}]   ;;  %s162_s1 = inlined_call_operand.hbm [shape: f32[8,32], index: 1, kind: input, shape index: {}]   ;;  %s163_s2 = inlined_call_operand.hbm [shape: f32[8,64], index: 2, kind: output, shape index: {}]  }
   0x1   :  { %8 = vsyncpa [#allocation6], 0 }
   0x2   :  { %9 = vsyncpa [#allocation4], 0  ;;  %s133_s9 = smov [#allocation2]   ;;  %s134_s11 = smov [#allocation5]  }
   0x3   :  { %s16_s10 = sshll.u32 %s133_s9, 4  ;;  %s26_s12 = sshll.u32 %s134_s11, 4  ;;  %s17_s10 = int_to_ptr.vmem [resolvable:$true] %s16_s10  ;;  %s27_s12 = int_to_ptr.vmem [resolvable:$true] %s26_s12 }
   0x4   :  { %s75_s13 = scalar_lea.vmem %s17_s10, 128  ;;  %p80_p1 = scmp.lt.s32.totalorder %s17_s10, %s17_s10 }
   0x5   :  { %p76_p0 = scmp.ne.s32.totalorder %s17_s10, %s75_s13  ;;  %p81_p2 = scmp.lt.s32.totalorder %s75_s13, %s75_s13 }
   0x7   :  { %p82_p3 = por %p81_p2, %p80_p1 }
   0x9   :  { %p83_p4 = pnand %p82_p3, %p76_p0 }
   0xb   :  { %86 = shalt.err (!%p83_p4)
}
   0xc   :  { %19 = dma.hbm_to_vmem [thread:$0]  %s161_s0, 128, %s17_s10, [#allocation3]  }
   0xd   :  { %s95_s16 = scalar_lea.vmem %s27_s12, 128  ;;  %p100_p6 = scmp.lt.s32.totalorder %s27_s12, %s27_s12 }
   0xe   :  { %p96_p5 = scmp.ne.s32.totalorder %s27_s12, %s95_s16  ;;  %p101_p7 = scmp.lt.s32.totalorder %s95_s16, %s95_s16 }
  0x10   :  { %p102_p8 = por %p101_p7, %p100_p6 }
  0x12   :  { %p103_p9 = pnand %p102_p8, %p96_p5 }
  0x14   :  { %106 = shalt.err (!%p103_p9)
}
  0x15   :  { %29 = dma.hbm_to_vmem [thread:$0]  %s162_s1, 128, %s27_s12, [#allocation6]  }
  0x16   :  { %127 = dma.done.wait [#allocation3], 128  }
  0x17   :  { %128 = vsyncadd [#allocation3], 4294967168 }
  0x18   :  { %129 = dma.done.wait [#allocation6], 128  }
  0x19   :  { %130 = vsyncadd [#allocation6], 4294967168  ;;  %v36_v0 = vld [vmem:[#allocation5] sm:$0xff]  ;;  %s135_s19 = smov 32   ;;  %vm41_vm0 = vcmask 261120   ;;  %v43_v1 = vld [vmem:[#allocation2] sm:$0xff] }
  0x1a   :  { %38 = vrot.lane.b32.xlu0 %v36_v0, %s135_s19  ;;  %s136_s0 = smov [#allocation7]   ;;  %vm45_vm1 = vcmask 523264  }
  0x1b   :  { %s53_s20 = sshll.u32 %s136_s0, 4  ;;  %s54_s20 = int_to_ptr.vmem [resolvable:$true] %s53_s20 }
  0x1c   :  { %s107_s21 = scalar_lea.vmem %s54_s20, 128  ;;  %p112_p11 = scmp.lt.s32.totalorder %s54_s20, %s54_s20 }
  0x1d   :  { %p108_p10 = scmp.ne.s32.totalorder %s54_s20, %s107_s21  ;;  %p113_p12 = scmp.lt.s32.totalorder %s107_s21, %s107_s21 }
  0x1f   :  { %p114_p13 = por %p113_p12, %p112_p11 }
  0x21   :  { %p115_p0 = pnand %p114_p13, %p108_p10 }
  0x8c   :  { %v39_v2 = vpop.permute.xlu0 %38 }
  0x8d   :  { %v42_v3 = vsel %vm41_vm0, %v36_v0, %v39_v2 }
  0x8e   :  { %v44_v4 = vadd.f32 %v43_v1, %v42_v3 }
  0x90   :  { %46 = vst.msk [vmem:[#allocation7] sm:$0xff] %vm45_vm1, %v44_v4 }
  0x91   :  { %118 = shalt.err (!%p115_p0)
}
  0x92   :  { %56 = dma.vmem_to_hbm [thread:$0]  %s54_s20, 128, %s163_s2, [#allocation4]  }
  0x93   :  { %131 = dma.done.wait [#allocation4], 128  }
  0x94   :  { %132 = vsyncadd [#allocation4], 4294967168 }
  0x95   :  { %60 = vsyncpa [#allocation3], 1 }
  0x96   :  { %61 = vsyncpa [#allocation6], 1 }
  0x97   :  { %62 = vsyncpa [#allocation4], 1 }

</bundles_post_ra>
